<compile_context>
chip_gen: v7x
topology: tpu7x:2x2x1
jax: 0.10.0
libtpu: 0.0.40
codegen_flags: <defaults>
</compile_context>

<pallas_src>
import numpy as np
import jax
import jax.numpy as jnp
from jax.experimental import pallas as pl
from jax.experimental.pallas import tpu as pltpu

MASK_LENGTH = 64
EMBED_DIM = 32
MLP_FACTOR = 2
POOLING = (2, 4, 8, 16, 32)
LN_EPS = 1e-5                                    # PyTorch nn.LayerNorm default
HIDDEN = EMBED_DIM * MLP_FACTOR                  # 64
F_REAL = sum(MASK_LENGTH // k for k in POOLING) + MASK_LENGTH   # 62 + 64 = 126
N_PIECES = len(POOLING) + 1                      # 5 pooled levels + raw mask
MAX_SHIFT = POOLING[-1] // 2                     # largest lane shift used (16)


def _layer_norm(y, gamma, beta):
    # One-pass biased variance (matches nn.LayerNorm), one XLU reduce saved.
    mean = jnp.mean(y, axis=-1, keepdims=True)
    mean_sq = jnp.mean(y * y, axis=-1, keepdims=True)
    var = jnp.maximum(mean_sq - mean * mean, 0.0)
    return (y - mean) * jax.lax.rsqrt(var + LN_EPS) * gamma + beta


def mask_embedding_kernel(x_ref, w1_ref, w2_ref, p_ref, out_ref, shift_ref):
    L = MASK_LENGTH
    H = HIDDEN
    E = EMBED_DIM
    x = x_ref[...]                                        # (TB, L) f32

    # Zero the only pad lanes the offset reloads can touch, so uninitialized
    # VMEM (possibly NaN) never reaches the matmul (NaN * 0 = NaN).
    shift_ref[:, L:L + MAX_SHIFT] = jnp.zeros((x.shape[0], MAX_SHIFT),
                                              jnp.float32)

    def shifted_left(v, s):
        # y[:, j] = v[:, j + s] for j < L - s (zero pad beyond -- those lanes
        # only ever hit zero rows of the scattered w1).
        shift_ref[:, 0:L] = v
        return shift_ref[:, s:s + L]

    # Log-tree max pooling: after the step for window k, m[:, k*i] equals
    # max(x[:, k*i : k*(i+1)]) for every pooled feature i.
    m = x
    pieces = []
    for k in POOLING:                                     # 2, 4, 8, 16, 32
        m = jnp.maximum(m, shifted_left(m, k // 2))
        pieces.append(m)
    pieces.append(x)                                      # raw-mask passthrough

    # First Linear as a sum of six (TB,L)x(L,H) MXU matmuls against the
    # zero-scattered weight blocks; lanes holding non-feature values multiply
    # zero rows and contribute nothing.
    h = jnp.dot(pieces[0], w1_ref[0:L, :], preferred_element_type=jnp.float32)
    for idx in range(1, N_PIECES):
        h = h + jnp.dot(pieces[idx], w1_ref[idx * L:(idx + 1) * L, :],
                        preferred_element_type=jnp.float32)

    # p rows: [bias; gamma; beta]; cols [0:H] -> layer 1, [H:H+E] -> layer 2.
    h = h + p_ref[0:1, 0:H]
    h = _layer_norm(h, p_ref[1:2, 0:H], p_ref[2:3, 0:H])
    h = h * jax.nn.sigmoid(h)                             # SiLU

    o = jnp.dot(h, w2_ref[...], preferred_element_type=jnp.float32)
    o = o + p_ref[0:1, H:H + E]
    o = _layer_norm(o, p_ref[1:2, H:H + E], p_ref[2:3, H:H + E])
    out_ref[...] = o.astype(out_ref.dtype)


def pack_params(params):
    """Host-side, one-time packing.

    * w1 (126, H) is scattered into a zero (6*64, H) matrix: block b holds the
      rows of pooling level b (k = POOLING[b]) at sublane offsets i*k, block 5
      holds the raw-mask rows densely.  This makes the in-kernel feature
      gather unnecessary.
    * The six bias / LayerNorm vectors are fused into one (3, H+E) array.
    """
    L = MASK_LENGTH
    w1 = np.asarray(params["w1"], dtype=np.float32)        # (126, H)
    assert w1.shape[0] == F_REAL
    w1s = np.zeros((N_PIECES * L, w1.shape[1]), np.float32)
    row = 0
    for blk, k in enumerate(POOLING):                      # pieces m2..m32
        for i in range(L // k):
            w1s[blk * L + i * k, :] = w1[row]
            row += 1
    for j in range(L):                                     # piece 5: raw mask
        w1s[len(POOLING) * L + j, :] = w1[row]
        row += 1
    assert row == F_REAL

    p1 = jnp.concatenate([params["b1"], params["g1"], params["be1"]], axis=0)
    p2 = jnp.concatenate([params["b2"], params["g2"], params["be2"]], axis=0)
    return {
        "w1": jnp.asarray(w1s),                            # (384, H)
        "w2": jnp.asarray(params["w2"], dtype=jnp.float32),  # (H, E)
        "p": jnp.concatenate([p1, p2], axis=1),            # (3, H+E)
    }


def mask_embedding(x, packed, *, block_b=None):
    # Accept (B, L) or (B, 1, L) like the PyTorch module.
    if x.ndim == 3:
        assert x.shape[1] == 1
        x = x[:, 0, :]
    elif x.ndim != 2:
        raise ValueError("Input should be 2d or 3d")
    B, L = x.shape
    assert L == MASK_LENGTH
    x = x.astype(jnp.float32)

    if block_b is None:
        block_b = 256                          # MXU-height tile for big batches
    tb = min(block_b, B)
    if tb != B and tb % 8 != 0:
        tb = max(8, (tb // 8) * 8)             # keep (8,128)-divisible blocks
    grid = (pl.cdiv(B, tb),)
    # Note: a partial last block (B % tb != 0) is fine -- rows are independent
    # (per-row pooling/Linear/LayerNorm) and Pallas masks the OOB writes.

    resident = lambda i: (0, 0)                # weights stay VMEM-resident
    return pl.pallas_call(
        mask_embedding_kernel,
        out_shape=jax.ShapeDtypeStruct((B, EMBED_DIM), jnp.float32),
        grid=grid,
        in_specs=[
            pl.BlockSpec((tb, L), lambda i: (i, 0)),            # x: streamed
            pl.BlockSpec((N_PIECES * L, HIDDEN), resident),     # scattered w1
            pl.BlockSpec((HIDDEN, EMBED_DIM), resident),        # w2
            pl.BlockSpec((3, HIDDEN + EMBED_DIM), resident),    # packed vecs
        ],
        out_specs=pl.BlockSpec((tb, EMBED_DIM), lambda i: (i, 0)),
        scratch_shapes=[pltpu.VMEM((tb, 128), jnp.float32)],    # shift scratch
        compiler_params=pltpu.CompilerParams(
            dimension_semantics=("parallel",)),
    )(x, packed["w1"], packed["w2"], packed["p"])


def reference(x, params):
    """Pure-JAX reference mirroring the PyTorch forward (unpacked params)."""
    B, L = x.shape
    pooled = [x.reshape(B, L // k, k).max(axis=-1) for k in POOLING]
    combined = jnp.concatenate(pooled + [x], axis=-1)            # (B, 126)
    h = combined @ params["w1"] + params["b1"]
    h = _layer_norm(h, params["g1"], params["be1"])
    h = h * jax.nn.sigmoid(h)
    o = h @ params["w2"] + params["b2"]
    o = _layer_norm(o, params["g2"], params["be2"])
    return o


if __name__ == "__main__":
    key = jax.random.PRNGKey(0)
    ks = jax.random.split(key, 9)

    B = 16                                     # small demo batch
    L = MASK_LENGTH                            # 64
    F = F_REAL                                 # 126
    H = HIDDEN                                 # 64
    E = EMBED_DIM                              # 32

    # Linear weights stored transposed vs PyTorch: W is (in, out), y = x@W + b.
    params = {
        "w1":  0.05 * jax.random.normal(ks[0], (F, H), jnp.float32),
        "b1":  0.01 * jax.random.normal(ks[1], (1, H), jnp.float32),
        "g1":  1.0 + 0.1 * jax.random.normal(ks[2], (1, H), jnp.float32),
        "be1": 0.1 * jax.random.normal(ks[3], (1, H), jnp.float32),
        "w2":  0.05 * jax.random.normal(ks[4], (H, E), jnp.float32),
        "b2":  0.01 * jax.random.normal(ks[5], (1, E), jnp.float32),
        "g2":  1.0 + 0.1 * jax.random.normal(ks[6], (1, E), jnp.float32),
        "be2": 0.1 * jax.random.normal(ks[7], (1, E), jnp.float32),
    }

    # Mask-like input in [0, 1).
    x = jax.random.uniform(ks[8], (B, L), jnp.float32)

    packed = pack_params(params)
    # block_b=8 -> 2 grid steps: exercises the streamed-x / resident-weight
    # pipeline even at this small demo size.
    out = jax.block_until_ready(mask_embedding(x, packed, block_b=8))

    ref = reference(x, params)
    assert out.shape == (B, E)
    assert jnp.allclose(out, ref, atol=1e-4, rtol=1e-4), "mismatch vs reference"
    print("KERNEL_OK")
</pallas_src>

<mosaic_0001>
module attributes {stable_mosaic.version = 11 : i64} {
  func.func @mask_embedding_kernel(%arg0: i32, %arg1: memref<8x64xf32, #tpu.memory_space<vmem>>, %arg2: memref<384x64xf32, #tpu.memory_space<vmem>>, %arg3: memref<64x32xf32, #tpu.memory_space<vmem>>, %arg4: memref<3x96xf32, #tpu.memory_space<vmem>>, %arg5: memref<8x32xf32, #tpu.memory_space<vmem>>, %arg6: memref<8x128xf32, #tpu.memory_space<vmem>>) attributes {dimension_semantics = [#tpu.dimension_semantics<parallel>], iteration_bounds = array<i64: 2>, scalar_prefetch = 0 : i64, scratch_operands = 1 : i64, tpu.core_type = #tpu.core_type<tc>, window_params = [{transform_indices = @transform_0, window_bounds = array<i64: 8, 64>}, {pipeline_mode = #tpu.pipeline_mode<synchronous>, transform_indices = @transform_1, window_bounds = array<i64: 384, 64>}, {pipeline_mode = #tpu.pipeline_mode<synchronous>, transform_indices = @transform_2, window_bounds = array<i64: 64, 32>}, {pipeline_mode = #tpu.pipeline_mode<synchronous>, transform_indices = @transform_3, window_bounds = array<i64: 3, 96>}, {transform_indices = @transform_4, window_bounds = array<i64: 8, 32>}]} {
    %c0 = arith.constant 0 : index
    %c0_0 = arith.constant 0 : index
    %0 = vector.load %arg1[%c0, %c0_0] : memref<8x64xf32, #tpu.memory_space<vmem>>, vector<8x64xf32>
    %cst = arith.constant 0.000000e+00 : f32
    %1 = vector.broadcast %cst : f32 to vector<8x16xf32>
    %c0_1 = arith.constant 0 : index
    %c64 = arith.constant 64 : index
    %2 = vector.load %arg6[%c0_1, %c64] : memref<8x128xf32, #tpu.memory_space<vmem>>, vector<8x16xf32>
    tpu.vector_store %arg6[%c0_1, %c64], %1 {strides = array<i32>} : memref<8x128xf32, #tpu.memory_space<vmem>>, vector<8x16xf32>,
    %c0_2 = arith.constant 0 : index
    %c0_3 = arith.constant 0 : index
    %3 = vector.load %arg6[%c0_2, %c0_3] : memref<8x128xf32, #tpu.memory_space<vmem>>, vector<8x64xf32>
    tpu.vector_store %arg6[%c0_2, %c0_3], %0 {strides = array<i32>} : memref<8x128xf32, #tpu.memory_space<vmem>>, vector<8x64xf32>,
    %c0_4 = arith.constant 0 : index
    %c1 = arith.constant 1 : index
    %4 = vector.load %arg6[%c0_4, %c1] : memref<8x128xf32, #tpu.memory_space<vmem>>, vector<8x64xf32>
    %5 = arith.maximumf %0, %4 : vector<8x64xf32>
    %c0_5 = arith.constant 0 : index
    %c0_6 = arith.constant 0 : index
    %6 = vector.load %arg6[%c0_5, %c0_6] : memref<8x128xf32, #tpu.memory_space<vmem>>, vector<8x64xf32>
    tpu.vector_store %arg6[%c0_5, %c0_6], %5 {strides = array<i32>} : memref<8x128xf32, #tpu.memory_space<vmem>>, vector<8x64xf32>,
    %c0_7 = arith.constant 0 : index
    %c2 = arith.constant 2 : index
    %7 = vector.load %arg6[%c0_7, %c2] : memref<8x128xf32, #tpu.memory_space<vmem>>, vector<8x64xf32>
    %8 = arith.maximumf %5, %7 : vector<8x64xf32>
    %c0_8 = arith.constant 0 : index
    %c0_9 = arith.constant 0 : index
    %9 = vector.load %arg6[%c0_8, %c0_9] : memref<8x128xf32, #tpu.memory_space<vmem>>, vector<8x64xf32>
    tpu.vector_store %arg6[%c0_8, %c0_9], %8 {strides = array<i32>} : memref<8x128xf32, #tpu.memory_space<vmem>>, vector<8x64xf32>,
    %c0_10 = arith.constant 0 : index
    %c4 = arith.constant 4 : index
    %10 = vector.load %arg6[%c0_10, %c4] : memref<8x128xf32, #tpu.memory_space<vmem>>, vector<8x64xf32>
    %11 = arith.maximumf %8, %10 : vector<8x64xf32>
    %c0_11 = arith.constant 0 : index
    %c0_12 = arith.constant 0 : index
    %12 = vector.load %arg6[%c0_11, %c0_12] : memref<8x128xf32, #tpu.memory_space<vmem>>, vector<8x64xf32>
    tpu.vector_store %arg6[%c0_11, %c0_12], %11 {strides = array<i32>} : memref<8x128xf32, #tpu.memory_space<vmem>>, vector<8x64xf32>,
    %c0_13 = arith.constant 0 : index
    %c8 = arith.constant 8 : index
    %13 = vector.load %arg6[%c0_13, %c8] : memref<8x128xf32, #tpu.memory_space<vmem>>, vector<8x64xf32>
    %14 = arith.maximumf %11, %13 : vector<8x64xf32>
    %c0_14 = arith.constant 0 : index
    %c0_15 = arith.constant 0 : index
    %15 = vector.load %arg6[%c0_14, %c0_15] : memref<8x128xf32, #tpu.memory_space<vmem>>, vector<8x64xf32>
    tpu.vector_store %arg6[%c0_14, %c0_15], %14 {strides = array<i32>} : memref<8x128xf32, #tpu.memory_space<vmem>>, vector<8x64xf32>,
    %c0_16 = arith.constant 0 : index
    %c16 = arith.constant 16 : index
    %16 = vector.load %arg6[%c0_16, %c16] : memref<8x128xf32, #tpu.memory_space<vmem>>, vector<8x64xf32>
    %17 = arith.maximumf %14, %16 : vector<8x64xf32>
    %c0_17 = arith.constant 0 : index
    %c0_18 = arith.constant 0 : index
    %18 = vector.load %arg2[%c0_17, %c0_18] : memref<384x64xf32, #tpu.memory_space<vmem>>, vector<64x64xf32>
    %cst_19 = arith.constant dense<0.000000e+00> : vector<8x64xf32>
    %19 = tpu.matmul %5, %18, %cst_19 {dimension_numbers = #tpu.dot_dimension_numbers<[1], [0], [0], [1], [0, 0, 1, 1], [], []>} : vector<8x64xf32>, vector<64x64xf32>, vector<8x64xf32> -> vector<8x64xf32>
    %c64_20 = arith.constant 64 : index
    %c0_21 = arith.constant 0 : index
    %20 = vector.load %arg2[%c64_20, %c0_21] : memref<384x64xf32, #tpu.memory_space<vmem>>, vector<64x64xf32>
    %cst_22 = arith.constant dense<0.000000e+00> : vector<8x64xf32>
    %21 = tpu.matmul %8, %20, %cst_22 {dimension_numbers = #tpu.dot_dimension_numbers<[1], [0], [0], [1], [0, 0, 1, 1], [], []>} : vector<8x64xf32>, vector<64x64xf32>, vector<8x64xf32> -> vector<8x64xf32>
    %22 = arith.addf %19, %21 : vector<8x64xf32>
    %c128 = arith.constant 128 : index
    %c0_23 = arith.constant 0 : index
    %23 = vector.load %arg2[%c128, %c0_23] : memref<384x64xf32, #tpu.memory_space<vmem>>, vector<64x64xf32>
    %cst_24 = arith.constant dense<0.000000e+00> : vector<8x64xf32>
    %24 = tpu.matmul %11, %23, %cst_24 {dimension_numbers = #tpu.dot_dimension_numbers<[1], [0], [0], [1], [0, 0, 1, 1], [], []>} : vector<8x64xf32>, vector<64x64xf32>, vector<8x64xf32> -> vector<8x64xf32>
    %25 = arith.addf %22, %24 : vector<8x64xf32>
    %c192 = arith.constant 192 : index
    %c0_25 = arith.constant 0 : index
    %26 = vector.load %arg2[%c192, %c0_25] : memref<384x64xf32, #tpu.memory_space<vmem>>, vector<64x64xf32>
    %cst_26 = arith.constant dense<0.000000e+00> : vector<8x64xf32>
    %27 = tpu.matmul %14, %26, %cst_26 {dimension_numbers = #tpu.dot_dimension_numbers<[1], [0], [0], [1], [0, 0, 1, 1], [], []>} : vector<8x64xf32>, vector<64x64xf32>, vector<8x64xf32> -> vector<8x64xf32>
    %28 = arith.addf %25, %27 : vector<8x64xf32>
    %c256 = arith.constant 256 : index
    %c0_27 = arith.constant 0 : index
    %29 = vector.load %arg2[%c256, %c0_27] : memref<384x64xf32, #tpu.memory_space<vmem>>, vector<64x64xf32>
    %cst_28 = arith.constant dense<0.000000e+00> : vector<8x64xf32>
    %30 = tpu.matmul %17, %29, %cst_28 {dimension_numbers = #tpu.dot_dimension_numbers<[1], [0], [0], [1], [0, 0, 1, 1], [], []>} : vector<8x64xf32>, vector<64x64xf32>, vector<8x64xf32> -> vector<8x64xf32>
    %31 = arith.addf %28, %30 : vector<8x64xf32>
    %c320 = arith.constant 320 : index
    %c0_29 = arith.constant 0 : index
    %32 = vector.load %arg2[%c320, %c0_29] : memref<384x64xf32, #tpu.memory_space<vmem>>, vector<64x64xf32>
    %cst_30 = arith.constant dense<0.000000e+00> : vector<8x64xf32>
    %33 = tpu.matmul %0, %32, %cst_30 {dimension_numbers = #tpu.dot_dimension_numbers<[1], [0], [0], [1], [0, 0, 1, 1], [], []>} : vector<8x64xf32>, vector<64x64xf32>, vector<8x64xf32> -> vector<8x64xf32>
    %34 = arith.addf %31, %33 : vector<8x64xf32>
    %c0_31 = arith.constant 0 : index
    %c0_32 = arith.constant 0 : index
    %35 = vector.load %arg4[%c0_31, %c0_32] : memref<3x96xf32, #tpu.memory_space<vmem>>, vector<1x64xf32>
    %36 = vector.broadcast %35 : vector<1x64xf32> to vector<8x64xf32>
    %37 = arith.addf %34, %36 : vector<8x64xf32>
    %c1_33 = arith.constant 1 : index
    %c0_34 = arith.constant 0 : index
    %38 = vector.load %arg4[%c1_33, %c0_34] : memref<3x96xf32, #tpu.memory_space<vmem>>, vector<1x64xf32>
    %c2_35 = arith.constant 2 : index
    %c0_36 = arith.constant 0 : index
    %39 = vector.load %arg4[%c2_35, %c0_36] : memref<3x96xf32, #tpu.memory_space<vmem>>, vector<1x64xf32>
    %cst_37 = arith.constant dense<0.000000e+00> : vector<8xf32>
    %40 = vector.multi_reduction <add>, %37, %cst_37 [1] : vector<8x64xf32> to vector<8xf32>
    %41 = vector.shape_cast %40 : vector<8xf32> to vector<8x1xf32>
    %cst_38 = arith.constant 6.400000e+01 : f32
    %42 = vector.broadcast %cst_38 : f32 to vector<8x1xf32>
    %43 = arith.divf %41, %42 : vector<8x1xf32>
    %44 = arith.mulf %37, %37 : vector<8x64xf32>
    %cst_39 = arith.constant dense<0.000000e+00> : vector<8xf32>
    %45 = vector.multi_reduction <add>, %44, %cst_39 [1] : vector<8x64xf32> to vector<8xf32>
    %46 = vector.shape_cast %45 : vector<8xf32> to vector<8x1xf32>
    %cst_40 = arith.constant 6.400000e+01 : f32
    %47 = vector.broadcast %cst_40 : f32 to vector<8x1xf32>
    %48 = arith.divf %46, %47 : vector<8x1xf32>
    %49 = arith.mulf %43, %43 : vector<8x1xf32>
    %50 = arith.subf %48, %49 : vector<8x1xf32>
    %cst_41 = arith.constant 0.000000e+00 : f32
    %51 = vector.broadcast %cst_41 : f32 to vector<8x1xf32>
    %52 = arith.maximumf %50, %51 : vector<8x1xf32>
    %53 = vector.broadcast %43 : vector<8x1xf32> to vector<8x64xf32>
    %54 = arith.subf %37, %53 : vector<8x64xf32>
    %cst_42 = arith.constant 9.99999974E-6 : f32
    %55 = vector.broadcast %cst_42 : f32 to vector<8x1xf32>
    %56 = arith.addf %52, %55 : vector<8x1xf32>
    %57 = math.rsqrt %56 : vector<8x1xf32>
    %58 = vector.broadcast %57 : vector<8x1xf32> to vector<8x64xf32>
    %59 = arith.mulf %54, %58 : vector<8x64xf32>
    %60 = vector.broadcast %38 : vector<1x64xf32> to vector<8x64xf32>
    %61 = arith.mulf %59, %60 : vector<8x64xf32>
    %62 = vector.broadcast %39 : vector<1x64xf32> to vector<8x64xf32>
    %63 = arith.addf %61, %62 : vector<8x64xf32>
    %64 = arith.negf %63 : vector<8x64xf32>
    %65 = math.exp %64 : vector<8x64xf32>
    %cst_43 = arith.constant 1.000000e+00 : f32
    %66 = vector.broadcast %cst_43 : f32 to vector<8x64xf32>
    %67 = arith.addf %66, %65 : vector<8x64xf32>
    %68 = arith.divf %66, %67 : vector<8x64xf32>
    %69 = arith.mulf %63, %68 : vector<8x64xf32>
    %c0_44 = arith.constant 0 : index
    %c0_45 = arith.constant 0 : index
    %70 = vector.load %arg3[%c0_44, %c0_45] : memref<64x32xf32, #tpu.memory_space<vmem>>, vector<64x32xf32>
    %cst_46 = arith.constant dense<0.000000e+00> : vector<8x32xf32>
    %71 = tpu.matmul %69, %70, %cst_46 {dimension_numbers = #tpu.dot_dimension_numbers<[1], [0], [0], [1], [0, 0, 1, 1], [], []>} : vector<8x64xf32>, vector<64x32xf32>, vector<8x32xf32> -> vector<8x32xf32>
    %c0_47 = arith.constant 0 : index
    %c64_48 = arith.constant 64 : index
    %72 = vector.load %arg4[%c0_47, %c64_48] : memref<3x96xf32, #tpu.memory_space<vmem>>, vector<1x32xf32>
    %73 = vector.broadcast %72 : vector<1x32xf32> to vector<8x32xf32>
    %74 = arith.addf %71, %73 : vector<8x32xf32>
    %c1_49 = arith.constant 1 : index
    %c64_50 = arith.constant 64 : index
    %75 = vector.load %arg4[%c1_49, %c64_50] : memref<3x96xf32, #tpu.memory_space<vmem>>, vector<1x32xf32>
    %c2_51 = arith.constant 2 : index
    %c64_52 = arith.constant 64 : index
    %76 = vector.load %arg4[%c2_51, %c64_52] : memref<3x96xf32, #tpu.memory_space<vmem>>, vector<1x32xf32>
    %cst_53 = arith.constant dense<0.000000e+00> : vector<8xf32>
    %77 = vector.multi_reduction <add>, %74, %cst_53 [1] : vector<8x32xf32> to vector<8xf32>
    %78 = vector.shape_cast %77 : vector<8xf32> to vector<8x1xf32>
    %cst_54 = arith.constant 3.200000e+01 : f32
    %79 = vector.broadcast %cst_54 : f32 to vector<8x1xf32>
    %80 = arith.divf %78, %79 : vector<8x1xf32>
    %81 = arith.mulf %74, %74 : vector<8x32xf32>
    %cst_55 = arith.constant dense<0.000000e+00> : vector<8xf32>
    %82 = vector.multi_reduction <add>, %81, %cst_55 [1] : vector<8x32xf32> to vector<8xf32>
    %83 = vector.shape_cast %82 : vector<8xf32> to vector<8x1xf32>
    %cst_56 = arith.constant 3.200000e+01 : f32
    %84 = vector.broadcast %cst_56 : f32 to vector<8x1xf32>
    %85 = arith.divf %83, %84 : vector<8x1xf32>
    %86 = arith.mulf %80, %80 : vector<8x1xf32>
    %87 = arith.subf %85, %86 : vector<8x1xf32>
    %cst_57 = arith.constant 0.000000e+00 : f32
    %88 = vector.broadcast %cst_57 : f32 to vector<8x1xf32>
    %89 = arith.maximumf %87, %88 : vector<8x1xf32>
    %90 = vector.broadcast %80 : vector<8x1xf32> to vector<8x32xf32>
    %91 = arith.subf %74, %90 : vector<8x32xf32>
    %cst_58 = arith.constant 9.99999974E-6 : f32
    %92 = vector.broadcast %cst_58 : f32 to vector<8x1xf32>
    %93 = arith.addf %89, %92 : vector<8x1xf32>
    %94 = math.rsqrt %93 : vector<8x1xf32>
    %95 = vector.broadcast %94 : vector<8x1xf32> to vector<8x32xf32>
    %96 = arith.mulf %91, %95 : vector<8x32xf32>
    %97 = vector.broadcast %75 : vector<1x32xf32> to vector<8x32xf32>
    %98 = arith.mulf %96, %97 : vector<8x32xf32>
    %99 = vector.broadcast %76 : vector<1x32xf32> to vector<8x32xf32>
    %100 = arith.addf %98, %99 : vector<8x32xf32>
    %c0_59 = arith.constant 0 : index
    %c0_60 = arith.constant 0 : index
    %101 = vector.load %arg5[%c0_59, %c0_60] : memref<8x32xf32, #tpu.memory_space<vmem>>, vector<8x32xf32>
    tpu.vector_store %arg5[%c0_59, %c0_60], %100 {strides = array<i32>} : memref<8x32xf32, #tpu.memory_space<vmem>>, vector<8x32xf32>,
    return
  }
  func.func @transform_0(%arg0: i32) -> (i32, i32) {
    %c0_i32 = arith.constant 0 : i32
    %c0_i32_0 = arith.constant 0 : i32
    return %arg0, %c0_i32 : i32, i32
  }
  func.func @transform_1(%arg0: i32) -> (i32, i32) {
    %c0_i32 = arith.constant 0 : i32
    %c0_i32_0 = arith.constant 0 : i32
    %c0_i32_1 = arith.constant 0 : i32
    return %c0_i32, %c0_i32_0 : i32, i32
  }
  func.func @transform_2(%arg0: i32) -> (i32, i32) {
    %c0_i32 = arith.constant 0 : i32
    %c0_i32_0 = arith.constant 0 : i32
    %c0_i32_1 = arith.constant 0 : i32
    return %c0_i32, %c0_i32_0 : i32, i32
  }
  func.func @transform_3(%arg0: i32) -> (i32, i32) {
    %c0_i32 = arith.constant 0 : i32
    %c0_i32_0 = arith.constant 0 : i32
    %c0_i32_1 = arith.constant 0 : i32
    return %c0_i32, %c0_i32_0 : i32, i32
  }
  func.func @transform_4(%arg0: i32) -> (i32, i32) {
    %c0_i32 = arith.constant 0 : i32
    %c0_i32_0 = arith.constant 0 : i32
    return %arg0, %c0_i32 : i32, i32
  }
}

</mosaic_0001>

<bundles_post_ra>
// kernel: tpu_custom_call.1
= control target key start
LH: loop header
LB: loop body
LE: loop exit
PB: predicated region body
PF: predicated region fallthrough
CT: control target
= control target key end

     0   :  { %9 = vsyncpa [#allocation4], 0  ;;  %s1752_s0 = inlined_call_operand.vmem [shape: f32[16,64], index: 0, kind: input, shape index: {}]   ;;  %s1753_s1 = inlined_call_operand.vmem [shape: f32[384,64], index: 1, kind: input, shape index: {}]   ;;  %s1754_s2 = inlined_call_operand.vmem [shape: f32[64,32], index: 2, kind: input, shape index: {}]   ;;  %s1755_s3 = inlined_call_operand.vmem [shape: f32[3,96], index: 3, kind: input, shape index: {}]   ;;  %s1756_s4 = inlined_call_operand.hbm [shape: f32[16,32], index: 4, kind: output, shape index: {}]  }
   0x1   :  { %11 = vsyncpa [#allocation4 + $0x1], 0  ;;  %s1407_s15 = smov 0   ;;  %s1409_s16 = smov 0  }
   0x2   :  { %s1411_s17 = smov 0   ;;  %s1413_s18 = smov 0  }
   0x3 LB: > { %s1428_s19 = sadd.s32 4294967295, %s1370_s18   ;;  %s951_s20 = sadd.s32 4294967294, %s1370_s18   ;;  %s1370_s18 = sphi %s1413_s18, %s1762_s18   ;;  %s1366_s17 = sphi %s1411_s17, %s1761_s17   ;;  %s1362_s16 = sphi %s1409_s16, %s1760_s16   ;;  %s1358_s15 = sphi %s1407_s15, %s1759_s15  }
   0x4   : > { %s1432_s21 = sadd.s32 1, %s1370_s18   ;;  %s113_s22 = sadd.s32 1, %s1366_s17 }
   0x5   : > { %s110_s23 = ssub.s32 %s1370_s18, %s1432_s21  ;;  %p123_p0 = scmp.ne.s32.totalorder %s1366_s17, %s1362_s16 }
   0x6   : > { %p111_p1 = scmp.eq.s32.totalorder %s110_s23, 0  ;;  %p124_p2 = scmp.eq.s32.totalorder %s1428_s19, 1 }
   0x7   : > { %p129_p3 = scmp.ne.s32.totalorder %s1362_s16, %s1358_s15  ;;  %p130_p4 = scmp.eq.s32.totalorder %s951_s20, 1 }
   0x8   : > { %s1443_s24 = scalar_select %p111_p1, %s1366_s17, %s113_s22  }
   0x9   : > { %p1445_p5 = por %p124_p2, %p123_p0  ;;  %p1449_p6 = por %p130_p4, %p129_p3 }
   0xa   : > { %p954_p7 = scmp.ge.s32.totalorder %s1370_s18, 1  ;;  %p164_p8 = scmp.lt.s32.totalorder %s1370_s18, 3 }
   0xc   : > { %p165_p9 = pnand %p954_p7, %p164_p8 }
   0xd   : > { %p189_p10 = scmp.lt.s32.totalorder (!%p165_p9), %s1428_s19, 1  ;;  %vm194_vm0 = vcmask (!%p165_p9), 654848   ;;  %v1372_v0 = vmov (!%p165_p9), 0.0   ;;  %v1373_v1 = vmov (!%p165_p9), 0.0|0.0   ;;  %v232_v2 = vld [vmem:[%s1753_s1] sm:$0xff] (!%p165_p9)  ;;  %v233_v3 = vld [vmem:[%s1753_s1 + $0x8] sm:$0xff] (!%p165_p9) }
   0xe   : > { %168 = sbr.rel (%p165_p9) target bundleno = 1467 (0x5bb), region = 36  ;;  %195 = vst.msk [vmem:[#allocation2] sm:$0xff] (!%p165_p9), %vm194_vm0, %v1372_v0  ;;  %1180 = vmatprep.subr.bf16.mxu1 (!%p165_p9), %v1373_v1  ;;  %v234_v4 = vld [vmem:[%s1753_s1 + $0x10] sm:$0xff] (!%p165_p9)  ;;  %1168 = vmatprep.subr.bf16.mxu0 (!%p165_p9), %v1373_v1  ;;  %v1181_v5 = vpack.c.bf16 (!%p165_p9), %v233_v3, %v232_v2  ;;  %v235_v6 = vld [vmem:[%s1753_s1 + $0x18] sm:$0xff] (!%p165_p9)  ;;  %vm1374_vm1 = vmmov (!%p165_p9), 0   ;;  %vm196_vm2 = vcmask (!%p165_p9), 523264  }
   0xf   : > { %1070 = vmatprep.mubr.msk.f32.mxu1 (!%p165_p9), %vm1374_vm1, %v1372_v0  ;;  %1051 = vmatprep.mubr.msk.f32.mxu0 (!%p165_p9), %vm1374_vm1, %v1372_v0  ;;  %v1184_v7 = vpack.c.bf16 (!%p165_p9), %v235_v6, %v234_v4  ;;  %v236_v8 = vld [vmem:[%s1753_s1 + $0x20] sm:$0xff] (!%p165_p9)  ;;  %v237_v9 = vld [vmem:[%s1753_s1 + $0x28] sm:$0xff] (!%p165_p9)  ;;  %v238_v12 = vld [vmem:[%s1753_s1 + $0x30] sm:$0xff] (!%p165_p9)  ;;  %s1376_s5 = smov (!%p165_p9), 126   ;;  %s1379_s30 = smov (!%p165_p9), 112   ;;  %vm849_vm3 = vcmask (!%p165_p9), 261120  }
  0x10   : > { %1182 = vmatpush3.bf16.msra.mxu1 (!%p165_p9), %v1181_v5  ;;  %v1187_v11 = vpack.c.bf16 (!%p165_p9), %v237_v9, %v236_v8  ;;  %v239_v13 = vld [vmem:[%s1753_s1 + $0x38] sm:$0xff] (!%p165_p9)  ;;  %v240_v15 = vld [vmem:[%s1753_s1 + $0x40] sm:$0xff] (!%p165_p9)  ;;  %v241_v16 = vld [vmem:[%s1753_s1 + $0x48] sm:$0xff] (!%p165_p9)  ;;  %s1380_s6 = smov (!%p165_p9), 64   ;;  %s186_s11 = sand.u32 (!%p165_p9), 1, %s1362_s16  }
  0x11   : > { %1183 = vmatprep.subr.bf16.mxu1 (!%p165_p9), %v1373_v1  ;;  %v1190_v14 = vpack.c.bf16 (!%p165_p9), %v239_v13, %v238_v12  ;;  %v242_v17 = vld [vmem:[%s1753_s1 + $0x50] sm:$0xff] (!%p165_p9)  ;;  %v1169_v18 = vpack.c.bf16 (!%p165_p9), %v241_v16, %v240_v15  ;;  %v243_v19 = vld [vmem:[%s1753_s1 + $0x58] sm:$0xff] (!%p165_p9)  ;;  %v244_v22 = vld [vmem:[%s1753_s1 + $0x60] sm:$0xff] (!%p165_p9)  ;;  %s955_s12 = sshll.u32 (!%p165_p9), %s186_s11, 3  ;;  %s879_s28 = scalar_lea.sflag (!%p165_p9), [#allocation4], %s186_s11 }
  0x12   : > { %v1172_v21 = vpack.c.bf16 (!%p165_p9), %v243_v19, %v242_v17  ;;  %v245_v23 = vld [vmem:[%s1753_s1 + $0x68] sm:$0xff] (!%p165_p9)  ;;  %v246_v25 = vld [vmem:[%s1753_s1 + $0x70] sm:$0xff] (!%p165_p9)  ;;  %v247_v26 = vld [vmem:[%s1753_s1 + $0x78] sm:$0xff] (!%p165_p9)  ;;  %s188_s14 = scalar_lea.vmem (!%p165_p9), [#allocation3], %s955_s12 }
  0x13   : > { %1170 = vmatpush3.bf16.msra.mxu0 (!%p165_p9), %v1169_v18  ;;  %v1175_v24 = vpack.c.bf16 (!%p165_p9), %v245_v23, %v244_v22  ;;  %v1178_v27 = vpack.c.bf16 (!%p165_p9), %v247_v26, %v246_v25  ;;  %v394_v31 = vld [vmem:[%s1753_s1 + $0x80] sm:$0xff] (!%p165_p9)  ;;  %v395_v32 = vld [vmem:[%s1753_s1 + $0x88] sm:$0xff] (!%p165_p9)  ;;  %v396_v36 = vld [vmem:[%s1753_s1 + $0x90] sm:$0xff] (!%p165_p9)  ;;  %s892_s20 = sshll.u32 (!%p165_p9), %s188_s14, 4  ;;  %s1711_s20 = int_to_ptr.vmem [resolvable:$true] %s892_s20 }
  0x14   : > { %1185 = vmatpush3.bf16.msra.mxu1 (!%p165_p9), %v1184_v7  ;;  %1171 = vmatprep.subr.bf16.mxu0 (!%p165_p9), %v1373_v1  ;;  %v1193_v34 = vpack.c.bf16 (!%p165_p9), %v395_v32, %v394_v31  ;;  %v397_v37 = vld [vmem:[%s1753_s1 + $0x98] sm:$0xff] (!%p165_p9)  ;;  %v398_v39 = vld [vmem:[%s1753_s1 + $0xa0] sm:$0xff] (!%p165_p9)  ;;  %v399_v40 = vld [vmem:[%s1753_s1 + $0xa8] sm:$0xff] (!%p165_p9)  ;;  %s1308_s29 = scalar_lea.vmem (!%p165_p9), %s1711_s20, 128 }
  0x15   : > { %s190_s7 = scalar_select %p189_p10, %s1428_s19, 1  ;;  %1186 = vmatprep.subr.bf16.mxu1 %v1373_v1  ;;  %v1196_v38 = vpack.c.bf16 %v397_v37, %v396_v36  ;;  %v1199_v41 = vpack.c.bf16 %v399_v40, %v398_v39  ;;  %v400_v42 = vld [vmem:[%s1753_s1 + $0xb0] sm:$0xff]  ;;  %v401_v43 = vld [vmem:[%s1753_s1 + $0xb8] sm:$0xff]  ;;  %v476_v46 = vld [vmem:[%s1753_s1 + $0xc0] sm:$0xff] }
  0x16   : > { %v1202_v45 = vpack.c.bf16 %v401_v43, %v400_v42  ;;  %v477_v47 = vld [vmem:[%s1753_s1 + $0xc8] sm:$0xff]  ;;  %v478_v48 = vld [vmem:[%s1753_s1 + $0xd0] sm:$0xff]  ;;  %v479_v50 = vld [vmem:[%s1753_s1 + $0xd8] sm:$0xff]  ;;  %p1309_p11 = scmp.ne.s32.totalorder %s1711_s20, %s1308_s29 }
  0x17   : > { %s956_s10 = sshll.u32 %s190_s7, 3  ;;  %1173 = vmatpush3.bf16.msra.mxu0 %v1172_v21  ;;  %v1205_v49 = vpack.c.bf16 %v477_v47, %v476_v46  ;;  %v1208_v53 = vpack.c.bf16 %v479_v50, %v478_v48  ;;  %v480_v54 = vld [vmem:[%s1753_s1 + $0xe0] sm:$0xff]  ;;  %v481_v55 = vld [vmem:[%s1753_s1 + $0xe8] sm:$0xff]  ;;  %v482_v57 = vld [vmem:[%s1753_s1 + $0xf0] sm:$0xff] }
  0x18   : > { %s192_s13 = scalar_lea.vmem %s1752_s0, %s956_s10  ;;  %1188 = vmatpush3.bf16.msra.mxu1 %v1187_v11  ;;  %1174 = vmatprep.subr.bf16.mxu0 %v1373_v1  ;;  %v1211_v56 = vpack.c.bf16 %v481_v55, %v480_v54  ;;  %v483_v58 = vld [vmem:[%s1753_s1 + $0xf8] sm:$0xff]  ;;  %v558_v63 = vld [vmem:[%s1753_s1 + $0x100] sm:$0xff]  ;;  %v559_v2 = vld [vmem:[%s1753_s1 + $0x108] sm:$0xff]  ;;  %p1310_p12 = pnand %p1309_p11, %p1445_p5 }
  0x19   : > { %v1486_v10 = vld [vmem:[%s192_s13] sm:$0xff]  ;;  %1189 = vmatprep.subr.bf16.mxu1 %v1373_v1  ;;  %s1375_s13 = smov 127   ;;  %v1214_v59 = vpack.c.bf16 %v483_v58, %v482_v57  ;;  %v1217_v3 = vpack.c.bf16 %v559_v2, %v558_v63  ;;  %v560_v4 = vld [vmem:[%s1753_s1 + $0x110] sm:$0xff]  ;;  %v561_v5 = vld [vmem:[%s1753_s1 + $0x118] sm:$0xff] }
  0x1a   : > { %197 = vst.msk [vmem:[#allocation2] sm:$0xff] %vm196_vm2, %v1486_v10  ;;  %v1220_v9 = vpack.c.bf16 %v561_v5, %v560_v4  ;;  %v562_v11 = vld [vmem:[%s1753_s1 + $0x120] sm:$0xff]  ;;  %v563_v12 = vld [vmem:[%s1753_s1 + $0x128] sm:$0xff]  ;;  %v565_v15 = vld [vmem:[%s1753_s1 + $0x138] sm:$0xff]  ;;  %p1311_p13 = pneg %p1310_p12 }
  0x1b   : > { %1176 = vmatpush3.bf16.msra.mxu0 %v1175_v24  ;;  %v1223_v13 = vpack.c.bf16 %v563_v12, %v562_v11  ;;  %v640_v17 = vld [vmem:[%s1753_s1 + $0x140] sm:$0xff]  ;;  %v641_v18 = vld [vmem:[%s1753_s1 + $0x148] sm:$0xff]  ;;  %v642_v22 = vld [vmem:[%s1753_s1 + $0x150] sm:$0xff] }
  0x1c   : > { %1191 = vmatpush3.bf16.msra.mxu1 %v1190_v14  ;;  %1177 = vmatprep.subr.bf16.mxu0 %v1373_v1  ;;  %v564_v14 = vld [vmem:[%s1753_s1 + $0x130] sm:$0xff]  ;;  %v643_v23 = vld [vmem:[%s1753_s1 + $0x158] sm:$0xff]  ;;  %v644_v25 = vld [vmem:[%s1753_s1 + $0x160] sm:$0xff] }
  0x1d   : > { %1204 = vmatprep.subr.bf16.mxu1 %v1373_v1  ;;  %v1226_v16 = vpack.c.bf16 %v565_v15, %v564_v14  ;;  %v1232_v24 = vpack.c.bf16 %v643_v23, %v642_v22  ;;  %v645_v26 = vld [vmem:[%s1753_s1 + $0x168] sm:$0xff]  ;;  %v768_v55 = vld [vmem:[%s1754_s2 + $0x20] sm:$0xff]  ;;  %v770_v58 = vld [vmem:[%s1754_s2 + $0x30] sm:$0xff] }
  0x1e   : > { %v765_v50 = vld [vmem:[%s1754_s2 + $0x8] sm:$0xff] }
  0x1f   : > { %1179 = vmatpush3.bf16.msra.mxu0 %v1178_v27  ;;  %v1235_v27 = vpack.c.bf16 %v645_v26, %v644_v25 }
  0x20   : > { %1192 = vmatprep.subr.bf16.mxu0 %v1373_v1 }
  0x21   : > { %v198_v20 = vld [vmem:[#allocation2] sm:$0xff] }
  0x22   : > { %200 = vrot.lane.b32.xlu0 %v198_v20, %s1375_s13  ;;  %v1229_v20 = vpack.c.bf16 %v641_v18, %v640_v17  ;;  %s969_s13 = sshll.u32 %s1428_s19, 7  ;;  %s1381_s19 = smov [#allocation3]  }
  0x23   : > { %s1709_s27 = scalar_lea.hbm %s1756_s4, %s969_s13 }
  0x94   : > { %v201_v28 = vpop.permute.xlu0 %200 }
  0x95   : > { %v203_v29 = vmax.f32 %v1486_v10, %v201_v28  ;;  %v646_v28 = vld [vmem:[%s1753_s1 + $0x170] sm:$0xff] }
  0x97   : > { %204 = vst.msk [vmem:[#allocation2] sm:$0xff] %vm196_vm2, %v203_v29  ;;  %1071 = vmatmul.mubr.msk.f32.vlgmr.msra.gmra.mrb[0].mxu1 %vm196_vm2, %v203_v29 }
  0x98   : > { %1108 = vmatprep.mubr.msk.f32.mxu1 %vm1374_vm1, %v1372_v0  ;;  %1206 = vmatpush3.bf16.msra.mxu1 %v1205_v49  ;;  %v764_v49 = vld [vmem:[%s1754_s2] sm:$0xff] }
  0x99   : > { %1207 = vmatprep.subr.bf16.mxu1 %v1373_v1 }
  0x9c   : > { %1209 = vmatpush3.bf16.msra.mxu1 %v1208_v53  ;;  %v767_v53 = vld [vmem:[%s1754_s2 + $0x18] sm:$0xff] }
  0x9d   : > { %1210 = vmatprep.subr.bf16.mxu1 %v1373_v1 }
  0x9e   : > { %v205_v30 = vld [vmem:[#allocation2] sm:$0xff] }
  0x9f   : > { %207 = vrot.lane.b32.xlu0 %v205_v30, %s1376_s5  ;;  %s1377_s5 = smov 124  }
  0xa0   : > { %1212 = vmatpush3.bf16.msra.mxu1 %v1211_v56  ;;  %v769_v56 = vld [vmem:[%s1754_s2 + $0x28] sm:$0xff] }
  0xa1   : > { %1213 = vmatprep.subr.bf16.mxu1 %v1373_v1  ;;  %v1247_v57 = vpack.c.bf16 %v769_v56, %v768_v55 }
  0xa4   : > { %1215 = vmatpush3.bf16.msra.mxu1 %v1214_v59  ;;  %v771_v59 = vld [vmem:[%s1754_s2 + $0x38] sm:$0xff] }
  0xa5   : > { %1228 = vmatprep.subr.bf16.mxu1 %v1373_v1 }
 0x111   : > { %v208_v33 = vpop.permute.xlu0 %207 }
 0x112   : > { %v210_v35 = vmax.f32 %v203_v29, %v208_v33  ;;  %v647_v29 = vld [vmem:[%s1753_s1 + $0x178] sm:$0xff] }
 0x113   : > { %v1238_v31 = vpack.c.bf16 %v647_v29, %v646_v28 }
 0x114   : > { %211 = vst.msk [vmem:[#allocation2] sm:$0xff] %vm196_vm2, %v210_v35  ;;  %1052 = vmatmul.mubr.msk.f32.vlgmr.msra.gmra.mrb[0].mxu0 %vm196_vm2, %v210_v35 }
 0x115   : > { %1194 = vmatpush3.bf16.msra.mxu0 %v1193_v34  ;;  %1089 = vmatprep.mubr.msk.f32.mxu0 %vm1374_vm1, %v1372_v0 }
 0x116   : > { %1195 = vmatprep.subr.bf16.mxu0 %v1373_v1 }
 0x119   : > { %1197 = vmatpush3.bf16.msra.mxu0 %v1196_v38 }
 0x11a   : > { %1198 = vmatprep.subr.bf16.mxu0 %v1373_v1 }
 0x11b   : > { %v212_v44 = vld [vmem:[#allocation2] sm:$0xff] }
 0x11c   : > { %214 = vrot.lane.b32.xlu1 %v212_v44, %s1377_s5  ;;  %s1378_s5 = smov 120  }
 0x11d   : > { %1200 = vmatpush3.bf16.msra.mxu0 %v1199_v41 }
 0x11e   : > { %1201 = vmatprep.subr.bf16.mxu0 %v1373_v1 }
 0x121   : > { %1203 = vmatpush3.bf16.msra.mxu0 %v1202_v45 }
 0x122   : > { %1216 = vmatprep.subr.bf16.mxu0 %v1373_v1 }
 0x16a   : > { %v390_v51 = vpop.f32.mrb[0].mxu1 }
 0x16b   : > { %v1072_v52 = vpop.f32.mrb[1].mxu1 }
 0x16c   : > { %v1241_v52 = vpack.c.bf16 %v765_v50, %v764_v49 }
 0x18e   : > { %v215_v60 = vpop.permute.xlu1 %214 }
 0x18f   : > { %v217_v61 = vmax.f32 %v210_v35, %v215_v60  ;;  %v1250_v60 = vpack.c.bf16 %v771_v59, %v770_v58 }
 0x191   : > { %218 = vst.msk [vmem:[#allocation2] sm:$0xff] %vm196_vm2, %v217_v61  ;;  %1090 = vmatmul.mubr.msk.f32.vlgmr.msra.gmra.mrb[2].mxu0 %vm196_vm2, %v217_v61 }
 0x192   : > { %1127 = vmatprep.mubr.msk.f32.mxu0 %vm1374_vm1, %v1372_v0  ;;  %1218 = vmatpush3.bf16.msra.mxu0 %v1217_v3 }
 0x193   : > { %1219 = vmatprep.subr.bf16.mxu0 %v1373_v1 }
 0x196   : > { %1221 = vmatpush3.bf16.msra.mxu0 %v1220_v9  ;;  %v964_v9 = vld [vmem:[%s1755_s3 + $0x1] ss:$0 sm:$0xff] }
 0x197   : > { %1222 = vmatprep.subr.bf16.mxu0 %v1373_v1 }
 0x198   : > { %v219_v62 = vld [vmem:[#allocation2] sm:$0xff] }
 0x199   : > { %221 = vrot.lane.b32.xlu1 %v219_v62, %s1378_s5 }
 0x19a   : > { %1224 = vmatpush3.bf16.msra.mxu0 %v1223_v13 }
 0x19b   : > { %1225 = vmatprep.subr.bf16.mxu0 %v1373_v1 }
 0x19e   : > { %1227 = vmatpush3.bf16.msra.mxu0 %v1226_v16 }
 0x19f   : > { %1240 = vmatprep.subr.bf16.mxu0 %v1373_v1 }
 0x1e7   : > { %v317_v6 = vpop.f32.mrb[0].mxu0 }
 0x1e8   : > { %v391_v7 = vadd.f32 %v390_v51, %v317_v6  ;;  %v1053_v8 = vpop.f32.mrb[1].mxu0  ;;  %v766_v51 = vld [vmem:[%s1754_s2 + $0x10] sm:$0xff] }
 0x1e9   : > { %v1244_v54 = vpack.c.bf16 %v767_v53, %v766_v51 }
 0x20b   : > { %v222_v19 = vpop.permute.xlu1 %221 }
 0x20c   : > { %v224_v21 = vmax.f32 %v217_v61, %v222_v19  ;;  %v965_v61 = vld [vmem:[%s1755_s3 + $0x2] ss:$0 sm:$0xff] }
 0x20e   : > { %225 = vst.msk [vmem:[#allocation2] sm:$0xff] %vm196_vm2, %v224_v21  ;;  %1109 = vmatmul.mubr.msk.f32.vlgmr.msra.gmra.mrb[2].mxu1 %vm196_vm2, %v224_v21 }
 0x20f   : > { %1230 = vmatpush3.bf16.msra.mxu1 %v1229_v20  ;;  %1146 = vmatprep.mubr.msk.f32.mxu1 %vm1374_vm1, %v1372_v0 }
 0x210   : > { %1231 = vmatprep.subr.bf16.mxu1 %v1373_v1 }
 0x213   : > { %1233 = vmatpush3.bf16.msra.mxu1 %v1232_v24 }
 0x214   : > { %1234 = vmatprep.subr.bf16.mxu1 %v1373_v1 }
 0x215   : > { %v226_v30 = vld [vmem:[#allocation2] sm:$0xff] }
 0x216   : > { %228 = vrot.lane.b32.xlu0 %v226_v30, %s1379_s30  ;;  %s1312_s30 = sshll.u32 %s1381_s19, 4  ;;  %s1313_s30 = int_to_ptr.vmem [resolvable:$false] %s1312_s30 }
 0x217   : > { %1236 = vmatpush3.bf16.msra.mxu1 %v1235_v27  ;;  %s1314_s5 = scalar_lea.vmem %s1313_s30, 256  ;;  %p1315_p0 = scmp.lt.s32.totalorder %s1711_s20, %s1313_s30 }
 0x218   : > { %1237 = vmatprep.subr.bf16.mxu1 %v1373_v1  ;;  %p1316_p1 = scmp.lt.s32.totalorder %s1314_s5, %s1308_s29 }
 0x21a   : > { %p1317_p2 = por %p1316_p1, %p1315_p0 }
 0x21b   : > { %1239 = vmatpush3.bf16.msra.mxu1 %v1238_v31 }
 0x21c   : > { %p1318_p3 = pnand %p1317_p2, %p1311_p13 }
 0x21e   : > { %1147 = vmatmul.mubr.msk.f32.vlgmr.msra.gmra.mrb[4].mxu1 %vm196_vm2, %v1486_v10  ;;  %v963_v10 = vld [vmem:[%s1755_s3] ss:$0 sm:$0xff] }
 0x264   : > { %v471_v32 = vpop.f32.mrb[2].mxu0 }
 0x265   : > { %v475_v33 = vadd.f32 %v471_v32, %v391_v7  ;;  %v1091_v34 = vpop.f32.mrb[3].mxu0 }
 0x288   : > { %v229_v35 = vpop.permute.xlu0 %228 }
 0x289   : > { %v231_v36 = vmax.f32 %v224_v21, %v229_v35 }
 0x28b   : > { %1128 = vmatmul.mubr.msk.f32.vlgmr.msra.gmra.mrb[4].mxu0 %vm196_vm2, %v231_v36 }
 0x28c   : > { %1165 = vmatprep.mubr.msk.f32.mxu0 %vm1374_vm1, %v1372_v0  ;;  %1242 = vmatpush3.bf16.msra.mxu0 %v1241_v52 }
 0x28d   : > { %1243 = vmatprep.subr.bf16.mxu0 %v1373_v1 }
 0x290   : > { %1245 = vmatpush3.bf16.msra.mxu0 %v1244_v54 }
 0x291   : > { %1246 = vmatprep.subr.bf16.mxu0 %v1373_v1 }
 0x294   : > { %1248 = vmatpush3.bf16.msra.mxu0 %v1247_v57 }
 0x295   : > { %1249 = vmatprep.subr.bf16.mxu0 %v1373_v1 }
 0x298   : > { %1251 = vmatpush3.bf16.msra.mxu0 %v1250_v60 }
 0x2e1   : > { %v553_v37 = vpop.f32.mrb[2].mxu1 }
 0x2e2   : > { %v557_v38 = vadd.f32 %v553_v37, %v475_v33  ;;  %v1110_v39 = vpop.f32.mrb[3].mxu1 }
 0x2f1   : > { %v717_v40 = vpop.f32.mrb[4].mxu1 }
 0x2f2   : > { %v1148_v41 = vpop.f32.mrb[5].mxu1 }
 0x35e   : > { %v635_v42 = vpop.f32.mrb[4].mxu0 }
 0x35f   : > { %v639_v43 = vadd.f32 %v635_v42, %v557_v38  ;;  %v1129_v44 = vpop.f32.mrb[5].mxu0 }
 0x361   : > { %v721_v45 = vadd.f32 %v717_v40, %v639_v43 }
 0x363   : > { %v727_v46 = vadd.f32 %v963_v10, %v721_v45 }
 0x365   : > { %v730_v47 = vsel %vm196_vm2, %v727_v46, 0.0  ;;  %v735_v48 = vmul.f32 %v727_v46, %v727_v46 }
 0x366   : > { %731 = vadd.xlane.f32.xlu1 %v730_v47 }
 0x367   : > { %v736_v0 = vsel %vm196_vm2, %v735_v48, 0.0 }
 0x368   : > { %737 = vadd.xlane.f32.xlu0 %v736_v0 }
 0x37e   : > { %773 = vrot.lane.b32.xlu0 %v963_v10, %s1380_s6 }
 0x382   : > { %873 = vrot.lane.b32.xlu0 %v965_v61, %s1380_s6 }
 0x3f3   : > { %v732_v62 = vpop.xlane.xlu1 %731 }
 0x3f4   : > { %v734_v63 = vmul.f32 0.015625, %v732_v62 }
 0x3f5   : > { %v738_v2 = vpop.xlane.xlu0 %737 }
 0x3f6   : > { %v740_v3 = vmul.f32 %v734_v63, %v734_v63  ;;  %v739_v4 = vmul.f32 0.015625, %v738_v2  ;;  %v743_v1 = vsub.f32 %v727_v46, %v734_v63 }
 0x3f8   : > { %v741_v5 = vsub.f32 %v739_v4, %v740_v3 }
 0x3f9   : > { %v774_v19 = vpop.permute.xlu0 %773 }
 0x3fa   : > { %v742_v6 = vmax.f32 %v741_v5, 0.0 }
 0x3fc   : > { %v744_v7 = vadd.f32 1e-05, %v742_v6 }
 0x3fd   : > { %v874_v38 = vpop.permute.xlu0 %873 }
 0x3fe   : > { %1300 = vrsqrt.f32 %v744_v7 }
 0x408   : > { %v1301_v8 = vpop.eup %1300 }
 0x409   : > { %v746_v11 = vmul.f32 %v1301_v8, %v743_v1 }
 0x40b   : > { %v751_v12 = vmul.f32 %v964_v9, %v746_v11 }
 0x40d   : > { %v756_v13 = vadd.f32 %v965_v61, %v751_v12 }
 0x40f   : > { %v966_v14 = vmul.f32 -1.442695, %v756_v13 }
 0x411   : > { %1302 = vpow2.f32 %v966_v14 }
 0x41b   : > { %v1303_v15 = vpop.eup %1302 }
 0x41c   : > { %v760_v16 = vadd.f32 1.0, %v1303_v15 }
 0x41e   : > { %1304 = vrcp.f32 %v760_v16 }
 0x428   : > { %v1305_v17 = vpop.eup %1304 }
 0x429   : > { %v763_v18 = vmul.f32 %v1305_v17, %v756_v13 }
 0x42b   : > { %1166 = vmatmul.mubr.msk.f32.vlgmr.msra.gmra.mrb[6].mxu0 %vm196_vm2, %v763_v18 }
 0x4fe   : > { %v845_v20 = vpop.f32.mrb[6].mxu0 }
 0x4ff   : > { %v846_v21 = vadd.f32 %v845_v20, %v774_v19  ;;  %v1167_v22 = vpop.f32.mrb[7].mxu0 }
 0x501   : > { %v850_v23 = vsel %vm849_vm3, %v846_v21, 0.0  ;;  %v855_v24 = vmul.f32 %v846_v21, %v846_v21 }
 0x502   : > { %851 = vadd.xlane.f32.xlu1 %v850_v23 }
 0x503   : > { %v856_v25 = vsel %vm849_vm3, %v855_v24, 0.0 }
 0x506   : > { %857 = vadd.xlane.f32.xlu1 %v856_v25 }
 0x517   : > { %868 = vrot.lane.b32.xlu1 %v964_v9, %s1380_s6 }
 0x58f   : > { %v852_v26 = vpop.xlane.xlu1 %851 }
 0x590   : > { %v854_v27 = vmul.f32 0.03125, %v852_v26 }
 0x592   : > { %v860_v29 = vmul.f32 %v854_v27, %v854_v27  ;;  %v863_v34 = vsub.f32 %v846_v21, %v854_v27 }
 0x593   : > { %v858_v28 = vpop.xlane.xlu1 %857 }
 0x594   : > { %v859_v30 = vmul.f32 0.03125, %v858_v28 }
 0x596   : > { %v861_v31 = vsub.f32 %v859_v30, %v860_v29 }
 0x597   : > { %v869_v36 = vpop.permute.xlu1 %868 }
 0x598   : > { %v862_v32 = vmax.f32 %v861_v31, 0.0 }
 0x59a   : > { %v864_v33 = vadd.f32 1e-05, %v862_v32 }
 0x59c   : > { %1306 = vrsqrt.f32 %v864_v33 }
 0x5a6   : > { %v1307_v35 = vpop.eup %1306 }
 0x5a7   : > { %v866_v37 = vmul.f32 %v1307_v35, %v863_v34 }
 0x5a9   : > { %v871_v39 = vmul.f32 %v869_v36, %v866_v37 }
 0x5ab   : > { %v876_v40 = vadd.f32 %v874_v38, %v871_v39 }
 0x5ad   : > { %877 = vst.msk [vmem:[%s188_s14] sm:$0xff] %vm849_vm3, %v876_v40 }
 0x5ae   : > { %1321 = shalt.err (!%p1318_p3)
}
 0x5af   : > { %s1322_s6 = scalar_lea.hbm %s1709_s27, 128  ;;  %s1326_s9 = scalar_lea.hbm %s1756_s4, 256 }
 0x5b0   : > { %p1323_p4 = scmp.ne.s32.totalorder %s1709_s27, %s1322_s6  ;;  %p1327_p9 = scmp.lt.u32.totalorder %s1709_s27, %s1756_s4 }
 0x5b1   : > { %p1328_p10 = scmp.lt.u32.totalorder %s1326_s9, %s1322_s6  ;;  %p1330_p12 = scmp.lt.u32.totalorder %s1322_s6, %s1709_s27 }
 0x5b2   : > { %p1324_p7 = pnand %p1323_p4, %p1445_p5 }
 0x5b3   : > { %p1329_p11 = por %p1328_p10, %p1327_p9 }
 0x5b4   : > { %p1325_p8 = pneg %p1324_p7 }
 0x5b5   : > { %p1331_p13 = por %p1330_p12, %p1329_p11 }
 0x5b7   : > { %p1332_p0 = pnand %p1331_p13, %p1325_p8 }
 0x5b9   : > { %1335 = shalt.err (!%p1332_p0)
}
 0x5ba   : > { %1252 = dma.vmem_to_hbm [thread:$0]  (%p1445_p5), %s1711_s20, 128, %s1709_s27, %s879_s28  }
 0x5bb PF: > { %p1258_p1 = scmp.ge.s32.totalorder %s1370_s18, 2  ;;  %s904_s12 = sand.u32 1, %s1358_s15  }
 0x5bc   : > { %s905_s13 = scalar_lea.sflag [#allocation4], %s904_s12 }
 0x5bd   : > { %p1255_p2 = pnand %p1258_p1, %p1449_p6 }
 0x5bf   : > { %1353 = dma.done.wait (!%p1255_p2), %s905_s13, 128  }
 0x5c0   : > { %1355 = vsyncadd (!%p1255_p2), %s905_s13, 4294967168  ;;  %p14_p3 = scmp.ge.s32.totalorder %s1432_s21, 4   ;;  %s1759_s15 = smov %s1362_s16 }
 0x5c1   : > { %s1760_s16 = smov %s1366_s17  ;;  %s1761_s17 = smov %s1443_s24 }
 0x5c2   : > { %s1762_s18 = smov %s1432_s21  ;;  %16 = sbr.rel (!%p14_p3) target bundleno = 3 (0x3), region = 71 }
 0x5c9   :  { %910 = vsyncpa [#allocation4], 1 }
 0x5ca   :  { %912 = vsyncpa [#allocation4 + $0x1], 1 }

</bundles_post_ra>
